<compile_context>
chip_gen: v7x
topology: tpu7x:2x2x1
jax: 0.10.0
libtpu: 0.0.40
codegen_flags: <defaults>
</compile_context>

<pallas_src>
import jax
import jax.numpy as jnp
from jax import lax
from jax.experimental import pallas as pl
from jax.experimental.pallas import tpu as pltpu


def _round_up(x, m):
    return ((x + m - 1) // m) * m


def _netw_kernel(x_ref, w_ref, b_ref, o_ref):
    # x: [TM, K]  batch tile (streamed)
    # w: [A, K]   PyTorch nn.Linear layout, grid-invariant -> stays in VMEM
    # b: [1, A]   grid-invariant
    # o: [TM, A]
    y = lax.dot_general(
        x_ref[...], w_ref[...],
        dimension_numbers=(((1,), (1,)), ((), ())),   # contract K with K
        preferred_element_type=jnp.float32,
        precision=lax.Precision.HIGHEST,              # fp32 parity; free (HBM-bound)
    )
    o_ref[...] = jnp.tanh(y + b_ref[...]).astype(o_ref.dtype)


def netw_2layer_forward(x, weight, bias, *, block_m=2048):
    """tanh(x @ weight.T + bias).

    x: [n, obs_size] ; weight: [n_actions, obs_size] (PyTorch layout) ;
    bias: [n_actions].  Returns [n, n_actions] float32.
    """
    x = x.astype(jnp.float32)
    weight = weight.astype(jnp.float32)
    bias = bias.astype(jnp.float32)

    n, k = x.shape
    a = weight.shape[0]
    b2 = bias.reshape(1, a)

    # ---- generation-aware VMEM budget -------------------------------------
    try:
        vmem_cap = int(pltpu.get_tpu_info().vmem_capacity_bytes)
    except Exception:
        vmem_cap = 64 << 20                      # conservative fallback (v7x)
    budget = max(vmem_cap - (8 << 20), 8 << 20)  # leave headroom below physical

    # Footprint: double-buffered x & out tiles (per row) + weight/bias
    # (budgeted double-buffered to be safe even though they are resident).
    per_row = 4 * (2 * k + 2 * a)
    fixed = 4 * 2 * (a * k + a)

    # ---- batch tile --------------------------------------------------------
    if n <= block_m:
        tm = n                                   # single full-dim block, no padding
    else:
        tm = _round_up(block_m, 8)               # sublane-aligned tile
        max_tm = max(8, ((budget - fixed) // per_row) // 8 * 8)
        tm = min(tm, max_tm)

    grid = (pl.cdiv(n, tm),)                     # partial last block; OOB rows masked

    vmem_limit = int(min(fixed + per_row * tm + (4 << 20), budget))

    return pl.pallas_call(
        _netw_kernel,
        out_shape=jax.ShapeDtypeStruct((n, a), jnp.float32),
        grid=grid,
        in_specs=[
            pl.BlockSpec((tm, k), lambda i: (i, 0)),   # x: streamed batch tiles
            pl.BlockSpec((a, k), lambda i: (0, 0)),    # weight: resident
            pl.BlockSpec((1, a), lambda i: (0, 0)),    # bias: resident
        ],
        out_specs=pl.BlockSpec((tm, a), lambda i: (i, 0)),
        compiler_params=pltpu.CompilerParams(
            dimension_semantics=("parallel",),         # megacore-shardable batch axis
            vmem_limit_bytes=vmem_limit,
        ),
    )(x, weight, b2)


if __name__ == "__main__":
    # Small shapes consistent with NetW_2Layer.forward: [n, obs_size] -> [n, n_actions]
    n, obs_size, n_actions = 4, 16, 8

    key = jax.random.PRNGKey(0)
    k_x, k_w, k_b = jax.random.split(key, 3)

    x = jax.random.normal(k_x, (n, obs_size), dtype=jnp.float32)
    # PyTorch nn.Linear default init: U(-1/sqrt(in_features), 1/sqrt(in_features))
    bound = 1.0 / (obs_size ** 0.5)
    weight = jax.random.uniform(
        k_w, (n_actions, obs_size), minval=-bound, maxval=bound, dtype=jnp.float32)
    bias = jax.random.uniform(
        k_b, (n_actions,), minval=-bound, maxval=bound, dtype=jnp.float32)

    out = netw_2layer_forward(x, weight, bias)
    out = jax.block_until_ready(out)

    # Pure-JAX reference (exact module semantics: linear -> tanh).
    ref = jnp.tanh(x @ weight.T + bias)
    assert out.shape == (n, n_actions)
    assert jnp.allclose(out, ref, atol=1e-5, rtol=1e-5)

    print("KERNEL_OK")
</pallas_src>

<mosaic_0001>
module attributes {stable_mosaic.version = 11 : i64} {
  func.func @_netw_kernel(%arg0: i32, %arg1: memref<4x16xf32, #tpu.memory_space<vmem>>, %arg2: memref<8x16xf32, #tpu.memory_space<vmem>>, %arg3: memref<1x8xf32, #tpu.memory_space<vmem>>, %arg4: memref<4x8xf32, #tpu.memory_space<vmem>>) attributes {dimension_semantics = [#tpu.dimension_semantics<parallel>], iteration_bounds = array<i64: 1>, scalar_prefetch = 0 : i64, scratch_operands = 0 : i64, tpu.core_type = #tpu.core_type<tc>, window_params = [{transform_indices = @transform_0, window_bounds = array<i64: 4, 16>}, {pipeline_mode = #tpu.pipeline_mode<synchronous>, transform_indices = @transform_1, window_bounds = array<i64: 8, 16>}, {pipeline_mode = #tpu.pipeline_mode<synchronous>, transform_indices = @transform_2, window_bounds = array<i64: 1, 8>}, {transform_indices = @transform_3, window_bounds = array<i64: 4, 8>}]} {
    %c0 = arith.constant 0 : index
    %c0_0 = arith.constant 0 : index
    %0 = vector.load %arg1[%c0, %c0_0] : memref<4x16xf32, #tpu.memory_space<vmem>>, vector<4x16xf32>
    %c0_1 = arith.constant 0 : index
    %c0_2 = arith.constant 0 : index
    %1 = vector.load %arg2[%c0_1, %c0_2] : memref<8x16xf32, #tpu.memory_space<vmem>>, vector<8x16xf32>
    %cst = arith.constant dense<0.000000e+00> : vector<4x8xf32>
    %2 = tpu.matmul %0, %1, %cst {dimension_numbers = #tpu.dot_dimension_numbers<[1], [1], [0], [0], [0, 0, 1, 0], [], []>, precision = #tpu.contract_precision<fp32>} : vector<4x16xf32>, vector<8x16xf32>, vector<4x8xf32> -> vector<4x8xf32>
    %c0_3 = arith.constant 0 : index
    %c0_4 = arith.constant 0 : index
    %3 = vector.load %arg3[%c0_3, %c0_4] : memref<1x8xf32, #tpu.memory_space<vmem>>, vector<1x8xf32>
    %4 = vector.broadcast %3 : vector<1x8xf32> to vector<4x8xf32>
    %5 = arith.addf %2, %4 : vector<4x8xf32>
    %6 = math.tanh %5 : vector<4x8xf32>
    %c0_5 = arith.constant 0 : index
    %c0_6 = arith.constant 0 : index
    %7 = vector.load %arg4[%c0_5, %c0_6] : memref<4x8xf32, #tpu.memory_space<vmem>>, vector<4x8xf32>
    tpu.vector_store %arg4[%c0_5, %c0_6], %6 {strides = array<i32>} : memref<4x8xf32, #tpu.memory_space<vmem>>, vector<4x8xf32>,
    return
  }
  func.func @transform_0(%arg0: i32) -> (i32, i32) {
    %c0_i32 = arith.constant 0 : i32
    %c0_i32_0 = arith.constant 0 : i32
    return %arg0, %c0_i32 : i32, i32
  }
  func.func @transform_1(%arg0: i32) -> (i32, i32) {
    %c0_i32 = arith.constant 0 : i32
    %c0_i32_0 = arith.constant 0 : i32
    %c0_i32_1 = arith.constant 0 : i32
    return %c0_i32, %c0_i32_0 : i32, i32
  }
  func.func @transform_2(%arg0: i32) -> (i32, i32) {
    %c0_i32 = arith.constant 0 : i32
    %c0_i32_0 = arith.constant 0 : i32
    %c0_i32_1 = arith.constant 0 : i32
    return %c0_i32, %c0_i32_0 : i32, i32
  }
  func.func @transform_3(%arg0: i32) -> (i32, i32) {
    %c0_i32 = arith.constant 0 : i32
    %c0_i32_0 = arith.constant 0 : i32
    return %arg0, %c0_i32 : i32, i32
  }
}

</mosaic_0001>

<bundles_post_ra>
// kernel: tpu_custom_call.1
= control target key start
LH: loop header
LB: loop body
LE: loop exit
PB: predicated region body
PF: predicated region fallthrough
CT: control target
= control target key end

     0   :  { %8 = vsyncpa [#allocation3], 0  ;;  %s722_s0 = inlined_call_operand.hbm [shape: f32[4,16], index: 0, kind: input, shape index: {}]   ;;  %s723_s1 = inlined_call_operand.hbm [shape: f32[8,16], index: 1, kind: input, shape index: {}]   ;;  %s724_s2 = inlined_call_operand.vmem [shape: f32[1,8], index: 2, kind: input, shape index: {}]   ;;  %s725_s3 = inlined_call_operand.hbm [shape: f32[4,8], index: 3, kind: output, shape index: {}]  }
   0x1   :  { %9 = vsyncpa [#allocation6], 0 }
   0x2   :  { %10 = vsyncpa [#allocation4], 0  ;;  %s652_s12 = smov [#allocation2]   ;;  %s653_s14 = smov [#allocation5]  }
   0x3   :  { %s17_s13 = sshll.u32 %s652_s12, 4  ;;  %s27_s15 = sshll.u32 %s653_s14, 4  ;;  %s18_s13 = int_to_ptr.vmem [resolvable:$true] %s17_s13  ;;  %s28_s15 = int_to_ptr.vmem [resolvable:$true] %s27_s15 }
   0x4   :  { %s580_s18 = scalar_lea.hbm %s722_s0, 64 }
   0x5   :  { %p581_p0 = scmp.ne.s32.totalorder %s722_s0, %s580_s18  ;;  %p584_p1 = scmp.lt.u32.totalorder %s580_s18, %s722_s0 }
   0x7   :  { %p586_p2 = pnand %p584_p1, %p581_p0 }
   0x9   :  { %589 = shalt.err (!%p586_p2)
}
   0xa   :  { %s590_s23 = scalar_lea.vmem %s18_s13, 64  ;;  %p595_p4 = scmp.lt.s32.totalorder %s18_s13, %s18_s13 }
   0xb   :  { %p591_p3 = scmp.ne.s32.totalorder %s18_s13, %s590_s23  ;;  %p596_p5 = scmp.lt.s32.totalorder %s590_s23, %s590_s23 }
   0xd   :  { %p597_p6 = por %p596_p5, %p595_p4 }
   0xf   :  { %p598_p7 = pnand %p597_p6, %p591_p3 }
  0x11   :  { %601 = shalt.err (!%p598_p7)
}
  0x12   :  { %20 = dma.hbm_to_vmem [thread:$0]  %s722_s0, 64, %s18_s13, [#allocation3]  }
  0x13   :  { %s602_s28 = scalar_lea.hbm %s723_s1, 128 }
  0x14   :  { %p603_p8 = scmp.ne.s32.totalorder %s723_s1, %s602_s28  ;;  %p606_p9 = scmp.lt.u32.totalorder %s602_s28, %s723_s1 }
  0x16   :  { %p608_p10 = pnand %p606_p9, %p603_p8 }
  0x18   :  { %611 = shalt.err (!%p608_p10)
}
  0x19   :  { %s612_s6 = scalar_lea.vmem %s28_s15, 128  ;;  %p617_p12 = scmp.lt.s32.totalorder %s28_s15, %s28_s15 }
  0x1a   :  { %p613_p11 = scmp.ne.s32.totalorder %s28_s15, %s612_s6  ;;  %p618_p13 = scmp.lt.s32.totalorder %s612_s6, %s612_s6 }
  0x1c   :  { %p619_p0 = por %p618_p13, %p617_p12 }
  0x1e   :  { %p620_p1 = pnand %p619_p0, %p613_p11 }
  0x20   :  { %623 = shalt.err (!%p620_p1)
}
  0x21   :  { %30 = dma.hbm_to_vmem [thread:$0]  %s723_s1, 128, %s28_s15, [#allocation6]  }
  0x22   :  { %646 = dma.done.wait [#allocation3], 64  }
  0x23   :  { %647 = vsyncadd [#allocation3], 4294967232 }
  0x24   :  { %648 = dma.done.wait [#allocation6], 128  }
  0x25   :  { %649 = vsyncadd [#allocation6], 4294967168  ;;  %v654_v0 = vmov 0.0   ;;  %vm655_vm0 = vmmov 0   ;;  %vm48_vm1 = vcmask 130048   ;;  %v40_v1 = vld [vmem:[#allocation5] sm:$0xff] }
  0x26   :  { %548 = vmatprep.subr.mxu0 %v654_v0  ;;  %533 = vmatprep.subr.mxu1 %v654_v0  ;;  %v39_v2 = vld [vmem:[#allocation2] sm:$0xf]  ;;  %v53_v3 = vsel %vm48_vm1, %v40_v1, 0  ;;  %s656_s9 = smov [#allocation7]   ;;  %vm502_vm2 = vcmask 60416  }
  0x27   :  { %550 = vmatprep.mubr.msk.f32.mxu0 %vm655_vm0, %v654_v0  ;;  %535 = vmatprep.mubr.msk.f32.mxu1 %vm655_vm0, %v654_v0  ;;  %v50_v4 = vsel %vm48_vm1, %v39_v2, 0  ;;  %v56_v5 = vand.u32 4294901760, %v53_v3  ;;  %v520_v17 = vld [vmem:[%s724_s2] ss:$0 sm:$0xff]  ;;  %s510_s10 = sshll.u32 %s656_s9, 4  ;;  %s511_s10 = int_to_ptr.vmem [resolvable:$true] %s510_s10 }
  0x28   :  { %v121_v6 = vand.u32 4294901760, %v50_v4  ;;  %s624_s11 = scalar_lea.vmem %s511_s10, 64  ;;  %p629_p3 = scmp.lt.s32.totalorder %s511_s10, %s511_s10 }
  0x29   :  { %v133_v7 = vsub.f32 %v53_v3, %v56_v5  ;;  %549 = vmatpush3.xpose.msra.mxu0 %v56_v5  ;;  %534 = vmatpush3.xpose.msra.mxu1 %v56_v5  ;;  %p625_p2 = scmp.ne.s32.totalorder %s511_s10, %s624_s11  ;;  %p630_p4 = scmp.lt.s32.totalorder %s624_s11, %s624_s11 }
  0x2a   :  { %v122_v8 = vsub.f32 %v50_v4, %v121_v6  ;;  %538 = vmatprep.subr.mxu1 %v654_v0  ;;  %553 = vmatprep.subr.mxu0 %v654_v0 }
  0x2b   :  { %v134_v10 = vand.u32 4294901760, %v133_v7  ;;  %p631_p5 = por %p630_p4, %p629_p3 }
  0x2c   :  { %v123_v9 = vand.u32 4294901760, %v122_v8 }
  0x2d   :  { %v135_v12 = vsub.f32 %v133_v7, %v134_v10  ;;  %p632_p6 = pnand %p631_p5, %p625_p2 }
  0x2e   :  { %551 = vmatmul.mubr.f32.vlgmr.msra.gmra.mrb[0].mxu0 %v123_v9  ;;  %v124_v11 = vsub.f32 %v122_v8, %v123_v9 }
  0x2f   :  { %554 = vmatpush3.xpose.msra.mxu0 %v134_v10  ;;  %555 = vmatprep.mubr.msk.f32.mxu0 %vm655_vm0, %v654_v0  ;;  %v136_v14 = vand.u32 4294901760, %v135_v12 }
  0x30   :  { %v125_v13 = vand.u32 4294901760, %v124_v11  ;;  %558 = vmatprep.subr.mxu0 %v654_v0 }
  0x32   :  { %536 = vmatmul.mubr.f32.vlgmr.msra.gmra.mrb[0].mxu1 %v125_v13 }
  0x33   :  { %539 = vmatpush3.xpose.msra.mxu1 %v136_v14  ;;  %540 = vmatprep.mubr.msk.f32.mxu1 %vm655_vm0, %v654_v0 }
  0x34   :  { %543 = vmatprep.subr.mxu1 %v654_v0 }
  0x36   :  { %556 = vmatmul.mubr.f32.vlgmr.msra.gmra.mrb[0].mxu0 %v121_v6 }
  0x37   :  { %559 = vmatpush3.xpose.msra.mxu0 %v56_v5  ;;  %560 = vmatprep.mubr.msk.f32.mxu0 %vm655_vm0, %v654_v0 }
  0x3a   :  { %541 = vmatmul.mubr.f32.vlgmr.msra.gmra.mrb[0].mxu1 %v121_v6 }
  0x3b   :  { %544 = vmatpush3.xpose.msra.mxu1 %v133_v7  ;;  %545 = vmatprep.mubr.msk.f32.mxu1 %vm655_vm0, %v654_v0 }
  0x3e   :  { %561 = vmatmul.mubr.f32.vlgmr.msra.gmra.mrb[0].mxu0 %v121_v6 }
  0x42   :  { %546 = vmatmul.mubr.f32.vlgmr.msra.gmra.mrb[0].mxu1 %v122_v8 }
 0x111   :  { %v497_v15 = vpop.f32.mrb[0].mxu0 }
 0x112   :  { %v562_v16 = vpop.f32.mrb[1].mxu0 }
 0x115   :  { %v277_v18 = vpop.f32.mrb[0].mxu1 }
 0x116   :  { %v563_v19 = vadd.f32 %v520_v17, %v277_v18  ;;  %v547_v20 = vpop.f32.mrb[1].mxu1 }
 0x118   :  { %v564_v21 = vadd.f32 %v563_v19, %v497_v15 }
 0x11a   :  { %578 = vtanh.f32 %v564_v21 }
 0x124   :  { %v579_v22 = vpop.eup %578 }
 0x125   :  { %503 = vst.msk [vmem:[#allocation7] sm:$0xf] %vm502_vm2, %v579_v22 }
 0x126   :  { %635 = shalt.err (!%p632_p6)
}
 0x127   :  { %s636_s13 = scalar_lea.hbm %s725_s3, 64 }
 0x128   :  { %p637_p7 = scmp.ne.s32.totalorder %s725_s3, %s636_s13  ;;  %p640_p8 = scmp.lt.u32.totalorder %s636_s13, %s725_s3 }
 0x12a   :  { %p642_p9 = pnand %p640_p8, %p637_p7 }
 0x12c   :  { %645 = shalt.err (!%p642_p9)
}
 0x12d   :  { %513 = dma.vmem_to_hbm [thread:$0]  %s511_s10, 64, %s725_s3, [#allocation4]  }
 0x12e   :  { %650 = dma.done.wait [#allocation4], 64  }
 0x12f   :  { %651 = vsyncadd [#allocation4], 4294967232 }
 0x130   :  { %517 = vsyncpa [#allocation3], 1 }
 0x131   :  { %518 = vsyncpa [#allocation6], 1 }
 0x132   :  { %519 = vsyncpa [#allocation4], 1 }

</bundles_post_ra>
